<compile_context>
chip_gen: v6e
topology: v6e:2x2x1
jax: 0.10.0
libtpu: 0.0.40
codegen_flags: <defaults>
</compile_context>

<pallas_src>
import warnings

import jax
import jax.numpy as jnp
from jax.experimental import pallas as pl
from jax.experimental.pallas import tpu as pltpu


_LANE = 128
_SUBLANE = {4: 8, 2: 16, 1: 32}          # min sublane tile per dtype itemsize
_TARGET_BLOCK_BYTES = 4 << 20            # ~4 MiB of useful data per block
_FALLBACK_COL_BLOCK = 64 * 1024          # (1, n) fallback: keep 8x-padded blocks <= 2 MiB VMEM


def _round_up(x, m):
    return ((x + m - 1) // m) * m


def _largest_divisor_in_range(n, lo, hi, multiple_of=None):
    best = None
    d = 1
    while d * d <= n:
        if n % d == 0:
            for c in (d, n // d):
                if lo <= c <= hi and (multiple_of is None or c % multiple_of == 0):
                    if best is None or c > best:
                        best = c
        d += 1
    return best


def _pick_view(n):
    """Copy-free 2D factorization (rows, cols) of the flat length-n stream.

    Prefers cols that exactly divide n (so the reshape is a pure bitcast: no pad,
    no slice), ideally a multiple of 128 for full lane density.  Falls back to the
    lane-major view (1, n) for awkward (e.g. prime) n -- still copy-free.
    """
    cols = (_largest_divisor_in_range(n, _LANE, 2048, multiple_of=_LANE)
            or _largest_divisor_in_range(n, _LANE, 2048))
    if cols is not None:
        return n // cols, cols
    return 1, n


def _pick_tiles(rows, cols, itemsize):
    sub = _SUBLANE[itemsize]
    if rows == 1:
        # Lane-major fallback view: sublane dim is 1 (8x padded in VMEM), so keep
        # column blocks modest; still split into >= 2 grid steps when possible.
        if cols <= 2 * _LANE:
            return 1, cols
        tn = min(_FALLBACK_COL_BLOCK, _round_up(pl.cdiv(cols, 2), _LANE))
        return 1, tn
    tn = cols                                   # block spans the full column dim
    if rows <= sub:
        return rows, tn                         # single (full-dim) row block
    tm_vmem = max(sub, (_TARGET_BLOCK_BYTES // (cols * itemsize)) // sub * sub)
    tm_split = _round_up(pl.cdiv(rows, 2), sub)  # guarantee >= 2 steps (both v7x TCs stream)
    return max(sub, min(tm_vmem, tm_split)), tn


def mlp_scalar_kernel(params_ref, x_ref, o_ref):
    # params_ref: SMEM f32[4] = [w1, b1, w2, b2] (scalar path, no tiny VMEM DMAs)
    # x_ref / o_ref: (tm, tn) tiles in VMEM (vector path); partial edge blocks are
    # read-padded / write-masked by Pallas, so no garbage reaches HBM.
    w1 = params_ref[0]
    b1 = params_ref[1]
    w2 = params_ref[2]
    b2 = params_ref[3]
    h = jnp.maximum(x_ref[...] * w1 + b1, 0.0)          # fc1 (1->1) + ReLU, VPU only
    o_ref[...] = (h * w2 + b2).astype(o_ref.dtype)       # out (1->1)


def model1_forward(x, w1, b1, w2, b2, *, donate_input=False):
    """Forward pass of Model1 (specialized to the 1 -> 1 -> 1 default widths)."""
    N, d_in = x.shape
    assert d_in == 1 and w1.shape == (1, 1) and w2.shape == (1, 1), (
        "kernel is specialized for Model1's default 1 -> 1 -> 1 widths")

    # Pack the 4 scalar parameters for the SMEM scalar path.
    params = jnp.concatenate(
        [w1.ravel(), b1.ravel(), w2.ravel(), b2.ravel()]).astype(jnp.float32)

    itemsize = jnp.dtype(x.dtype).itemsize
    rows, cols = _pick_view(N)
    tm, tn = _pick_tiles(rows, cols, itemsize)
    grid = (pl.cdiv(rows, tm), pl.cdiv(cols, tn))

    # Copy-free view of the (N, 1) column as a (rows, cols) slab (bitcast reshape).
    x2d = x.reshape(rows, cols)

    # Explicit scoped-VMEM budget: double-buffered in+out blocks plus slack, kept
    # under v7x's 64 MiB per-TC VMEM (and raising v5e's 16 MiB default).
    sub = _SUBLANE[itemsize]
    block_bytes = _round_up(tm, sub) * _round_up(tn, _LANE) * itemsize
    vmem_limit = int(min(max(6 * block_bytes, 32 << 20), 48 << 20))

    out2d = pl.pallas_call(
        mlp_scalar_kernel,
        out_shape=jax.ShapeDtypeStruct((rows, cols), x.dtype),
        grid=grid,
        in_specs=[
            pl.BlockSpec(memory_space=pltpu.MemorySpace.SMEM),   # scalar params
            pl.BlockSpec((tm, tn), lambda i, j: (i, j)),          # x slab
        ],
        out_specs=pl.BlockSpec((tm, tn), lambda i, j: (i, j)),
        compiler_params=pltpu.CompilerParams(
            # Both axes independent -> megacore sharding on v7x (CORE_PARALLEL on the
            # row axis would be an explicit alternative).
            dimension_semantics=("parallel", "parallel"),
            vmem_limit_bytes=vmem_limit,
        ),
        # Reuse the input slab as the output when the caller donates x; without
        # donation XLA copy-protects the operand, so this is opt-in.
        input_output_aliases=({1: 0} if donate_input else {}),
    )(params, x2d)

    # Copy-free reshape back to the (N, 1) module output shape.
    return out2d.reshape(N, 1)


def _reference(x, w1, b1, w2, b2):
    return jnp.maximum(x @ w1 + b1, 0.0) @ w2 + b2


if __name__ == "__main__":
    warnings.filterwarnings("ignore", message="Some donated buffers were not usable")

    D_IN, H1, D_OUT = 1, 1, 1  # Model1 defaults

    key = jax.random.PRNGKey(0)
    kx, k1, k2, k3, k4 = jax.random.split(key, 5)

    # PyTorch-style uniform(-1/sqrt(fan_in), +1/sqrt(fan_in)) init.
    bound1 = 1.0 / (D_IN ** 0.5)
    bound2 = 1.0 / (H1 ** 0.5)
    w1 = jax.random.uniform(k1, (D_IN, H1), jnp.float32, -bound1, bound1)
    b1 = jax.random.uniform(k2, (H1,), jnp.float32, -bound1, bound1)
    w2 = jax.random.uniform(k3, (H1, D_OUT), jnp.float32, -bound2, bound2)
    b2 = jax.random.uniform(k4, (H1 and D_OUT,), jnp.float32, -bound2, bound2)

    fwd = jax.jit(model1_forward, static_argnames=("donate_input",))

    # Small + awkward sizes (exercise the divisor path, the lane-major fallback,
    # and partial-block tails), plus the module's native batch of 100000 rows.
    for n in (127, 256, 300, 4099, 100000):
        x = jax.random.normal(jax.random.fold_in(kx, n), (n, D_IN), jnp.float32)
        ref = _reference(x, w1, b1, w2, b2)
        out = jax.block_until_ready(fwd(x, w1, b1, w2, b2))
        assert out.shape == (n, D_OUT)
        assert jnp.allclose(out, ref, atol=1e-5, rtol=1e-5)

    # Donated / aliased path: the input slab doubles as the output buffer.
    fwd_donated = jax.jit(model1_forward, static_argnames=("donate_input",),
                          donate_argnums=(0,))
    n = 4096
    x = jax.random.normal(jax.random.fold_in(kx, 1), (n, D_IN), jnp.float32)
    ref = _reference(x, w1, b1, w2, b2)
    out = jax.block_until_ready(fwd_donated(x, w1, b1, w2, b2, donate_input=True))
    assert out.shape == (n, D_OUT)
    assert jnp.allclose(out, ref, atol=1e-5, rtol=1e-5)

    print("KERNEL_OK")
</pallas_src>

<mosaic_0001>
module attributes {stable_mosaic.version = 11 : i64} {
  func.func @mlp_scalar_kernel(%arg0: i32, %arg1: i32, %arg2: memref<4xf32, #tpu.memory_space<smem>>, %arg3: memref<1x127xf32, #tpu.memory_space<vmem>>, %arg4: memref<1x127xf32, #tpu.memory_space<vmem>>) attributes {dimension_semantics = [#tpu.dimension_semantics<parallel>, #tpu.dimension_semantics<parallel>], iteration_bounds = array<i64: 1, 1>, scalar_prefetch = 0 : i64, scratch_operands = 0 : i64, tpu.core_type = #tpu.core_type<tc>, window_params = [{transform_indices = @transform_0, window_bounds = array<i64: 4>}, {transform_indices = @transform_1, window_bounds = array<i64: 1, 127>}, {transform_indices = @transform_2, window_bounds = array<i64: 1, 127>}]} {
    %c0 = arith.constant 0 : index
    %0 = memref.load %arg2[%c0] : memref<4xf32, #tpu.memory_space<smem>>
    %c1 = arith.constant 1 : index
    %1 = memref.load %arg2[%c1] : memref<4xf32, #tpu.memory_space<smem>>
    %c2 = arith.constant 2 : index
    %2 = memref.load %arg2[%c2] : memref<4xf32, #tpu.memory_space<smem>>
    %c3 = arith.constant 3 : index
    %3 = memref.load %arg2[%c3] : memref<4xf32, #tpu.memory_space<smem>>
    %c0_0 = arith.constant 0 : index
    %c0_1 = arith.constant 0 : index
    %4 = vector.load %arg3[%c0_0, %c0_1] : memref<1x127xf32, #tpu.memory_space<vmem>>, vector<1x127xf32>
    %5 = vector.broadcast %0 : f32 to vector<1x127xf32>
    %6 = arith.mulf %4, %5 : vector<1x127xf32>
    %7 = vector.broadcast %1 : f32 to vector<1x127xf32>
    %8 = arith.addf %6, %7 : vector<1x127xf32>
    %cst = arith.constant 0.000000e+00 : f32
    %9 = vector.broadcast %cst : f32 to vector<1x127xf32>
    %10 = arith.maximumf %8, %9 : vector<1x127xf32>
    %11 = vector.broadcast %2 : f32 to vector<1x127xf32>
    %12 = arith.mulf %10, %11 : vector<1x127xf32>
    %13 = vector.broadcast %3 : f32 to vector<1x127xf32>
    %14 = arith.addf %12, %13 : vector<1x127xf32>
    %c0_2 = arith.constant 0 : index
    %c0_3 = arith.constant 0 : index
    %15 = vector.load %arg4[%c0_2, %c0_3] : memref<1x127xf32, #tpu.memory_space<vmem>>, vector<1x127xf32>
    tpu.vector_store %arg4[%c0_2, %c0_3], %14 {strides = array<i32>} : memref<1x127xf32, #tpu.memory_space<vmem>>, vector<1x127xf32>,
    return
  }
  func.func @transform_0(%arg0: i32, %arg1: i32) -> i32 {
    %c0_i32 = arith.constant 0 : i32
    %c0_i32_0 = arith.constant 0 : i32
    return %c0_i32 : i32
  }
  func.func @transform_1(%arg0: i32, %arg1: i32) -> (i32, i32) {
    %c0_i32 = arith.constant 0 : i32
    return %arg0, %arg1 : i32, i32
  }
  func.func @transform_2(%arg0: i32, %arg1: i32) -> (i32, i32) {
    %c0_i32 = arith.constant 0 : i32
    return %arg0, %arg1 : i32, i32
  }
}

</mosaic_0001>

<bundles_post_ra>
// kernel: model1_forward.1
= control target key start
LH: loop header
LB: loop body
LE: loop exit
PB: predicated region body
PF: predicated region fallthrough
CT: control target
= control target key end

     0   :  { %7 = vsyncpa [#allocation4], 0  ;;  %s123_s0 = inlined_call_operand.vmem [shape: f32[4], index: 0, kind: input, shape index: {}]   ;;  %s124_s1 = inlined_call_operand.vmem [shape: f32[1,127], index: 1, kind: input, shape index: {}]   ;;  %s125_s2 = inlined_call_operand.hbm [shape: f32[1,127], index: 2, kind: output, shape index: {}]  }
   0x1   :  { %8 = vsyncpa [#allocation3], 0  ;;  %s15_s11 = sshll.u32 %s123_s0, 4  ;;  %s16_s11 = int_to_ptr.vmem [resolvable:$true] %s15_s11 }
   0x2   :  { %s61_s12 = scalar_lea.vmem %s16_s11, 16  ;;  %p66_p1 = scmp.lt.s32.totalorder %s16_s11, %s16_s11 }
   0x3   :  { %p62_p0 = scmp.ne.s32.totalorder %s16_s11, %s61_s12  ;;  %p67_p2 = scmp.lt.s32.totalorder %s61_s12, %s61_s12 }
   0x5   :  { %p68_p3 = por %p67_p2, %p66_p1 }
   0x7   :  { %p69_p4 = pnand %p68_p3, %p62_p0 }
   0x9   :  { %72 = shalt.err (!%p69_p4)
}
   0xa   :  { %s97_s13 = smov [#allocation2]  }
   0xb   :  { %18 = dma.vmem_to_smem %s16_s11, 16, %s97_s13, [#allocation4]  }
   0xc   :  { %93 = dma.done.wait [#allocation4], 16  }
   0xd   :  { %94 = vsyncadd [#allocation4], 4294967280 }
   0xe   :  { %24 = sfence }
   0xf   :  { %s25_s14 = sld [smem:[#allocation2]]  ;;  %v29_v0 = vld [vmem:[%s124_s1] sm:$0x1]  ;;  %s98_s0 = smov [#allocation5]   ;;  %vm39_vm0 = vcmask 1032192  }
  0x10   :  { %s56_s15 = sld [smem:[#allocation2 + $0x1]]  ;;  %s47_s20 = sshll.u32 %s98_s0, 4  ;;  %s48_s20 = int_to_ptr.vmem [resolvable:$true] %s47_s20 }
  0x11   :  { %s57_s16 = sld [smem:[#allocation2 + $0x2]]  ;;  %s73_s21 = scalar_lea.vmem %s48_s20, 16 }
  0x12   :  { %s58_s17 = sld [smem:[#allocation2 + $0x3]]  ;;  %p74_p5 = scmp.ne.s32.totalorder %s48_s20, %s73_s21 }
  0x13   :  { %s77_s22 = scalar_lea.vmem %s48_s20, 32  ;;  %p78_p6 = scmp.lt.s32.totalorder %s48_s20, %s48_s20 }
  0x14   :  { %p79_p7 = scmp.lt.s32.totalorder %s77_s22, %s73_s21 }
  0x15   :  { %v30_v1 = vstv %s25_s14 }
  0x16   :  { %v31_v2 = vmul.f32 %v30_v1, %v29_v0  ;;  %v32_v3 = vstv %s56_s15  ;;  %p80_p8 = por %p79_p7, %p78_p6 }
  0x17   :  { %v35_v5 = vstv %s57_s16 }
  0x18   :  { %v33_v4 = vadd.f32 %v32_v3, %v31_v2  ;;  %v37_v7 = vstv %s58_s17  ;;  %p81_p9 = pnand %p80_p8, %p74_p5 }
  0x1a   :  { %v34_v6 = vmax.f32 %v33_v4, 0.0 }
  0x1c   :  { %v36_v8 = vmul.f32 %v35_v5, %v34_v6 }
  0x1e   :  { %v38_v9 = vadd.f32 %v37_v7, %v36_v8 }
  0x20   :  { %40 = vst.msk [vmem:[#allocation5] sm:$0x1] %vm39_vm0, %v38_v9 }
  0x21   :  { %84 = shalt.err (!%p81_p9)
}
  0x22   :  { %50 = dma.vmem_to_hbm [thread:$0]  %s48_s20, 16, %s125_s2, [#allocation3]  }
  0x23   :  { %95 = dma.done.wait [#allocation3], 16  }
  0x24   :  { %96 = vsyncadd [#allocation3], 4294967280 }
  0x25   :  { %54 = vsyncpa [#allocation3], 1 }
  0x26   :  { %55 = vsyncpa [#allocation4], 1 }

</bundles_post_ra>
